<compile_context>
chip_gen: v7x
topology: tpu7x:2x2x1
jax: 0.10.0
libtpu: 0.0.40
codegen_flags: <defaults>
</compile_context>

<pallas_src>
import functools
import math

import jax
import jax.numpy as jnp
from jax.experimental import pallas as pl
from jax.experimental.pallas import tpu as pltpu


def _round_up(x, m):
    return (x + m - 1) // m * m


def _upsample_conv_kernel(x_ref, w_ref, b_ref, o_ref, stk_ref, *, wp2, cp, s_blk):
    """One (batch, spatial-block) grid step.

    x_ref   : VMEM (1, 1, Cp, WIN)     halo'd input window (flat, stride W+2)
    w_ref   : VMEM (4*Cout, 9*Cp)      folded polyphase weights [phase*Cout, shift*Cp]
    b_ref   : VMEM (4*Cout, 1)         bias (f32), repeated per phase
    o_ref   : VMEM (1, 4*Cout, S_BLK)  per-phase outputs (lane-dense)
    stk_ref : VMEM (9*Cp, S_BLK)       stacked shifted slabs (matmul RHS)
    """
    # Gather the 9 distinct (row, col)-shifted slabs once (static lane offsets),
    # stacking them along the contraction (sublane) axis.  No wraparound masks are
    # needed because the flat layout has stride W+2 (zero-padded row borders).
    for ro in (-1, 0, 1):
        for co in (-1, 0, 1):
            j = (ro + 1) * 3 + (co + 1)
            off = (ro + 1) * wp2 + co + 1
            stk_ref[j * cp:(j + 1) * cp, :] = x_ref[0, 0, :, off:off + s_blk]
    # Single deep-contraction MXU matmul producing all 4 phases at once.
    acc = jnp.dot(w_ref[...], stk_ref[...], preferred_element_type=jnp.float32)
    o_ref[0] = (acc + b_ref[...]).astype(o_ref.dtype)


def upsample_forward(x, weight, bias, *, compute_dtype=jnp.bfloat16, s_blk_max=512):
    """x: (N,C,H,W), weight: (Cout,C,3,3), bias: (Cout,). Returns (N,Cout,2H,2W).

    compute_dtype controls the MXU operand dtype (bf16 default = native MXU rate
    on v5e/v6e/v7x); accumulation is always f32.  Pass jnp.float32 for bit-level
    parity with the f32 PyTorch module.
    """
    N, C, H, W = x.shape
    Cout = weight.shape[0]
    assert weight.shape[1] == C

    cdt = jnp.dtype(compute_dtype)
    sub = 8 * (4 // cdt.itemsize)                 # sublane multiple: 8 (f32) / 16 (bf16)
    Cp = _round_up(C, sub)

    Wp2 = W + 2                                   # flat stride (per-row zero borders)
    So = H * Wp2                                  # flat output extent in that layout
    S_BLK = min(s_blk_max, _round_up(pl.cdiv(So, 2), 128))   # >=2 blocks when possible
    n_blk = pl.cdiv(So, S_BLK)
    So_p = n_blk * S_BLK
    WIN = S_BLK + 2 * Wp2 + 2                     # spatial block + 3x3 halo

    # ---- wrapper-side layout plumbing ------------------------------------------
    xq = x.astype(compute_dtype)
    xp = jnp.pad(xq, ((0, 0), (0, Cp - C), (1, 1), (1, 1)))      # (N,Cp,H+2,W+2), zeros
    xf = xp.reshape(N, Cp, (H + 2) * Wp2)
    xf = jnp.pad(xf, ((0, 0), (0, 0), (1, So_p - So + 1)))       # flat halo margins
    # Pre-halo'd overlapping windows -> all in-kernel slices are static.
    xwin = jnp.stack([xf[:, :, k * S_BLK:k * S_BLK + WIN] for k in range(n_blk)], axis=1)

    # Polyphase fold: conv3x3(nearest2x(x)) == 4 phase-convs with 2x2 effective taps
    # (sums of the original 3x3 taps).  Pack all phases x 9 shift slots x Cp channels
    # into one weight matrix; slots unused by a phase stay zero.
    A = jnp.array([[[1., 0., 0.], [0., 1., 1.]],
                   [[1., 1., 0.], [0., 0., 1.]]], dtype=jnp.float32)   # [a, d, kh]
    weff = jnp.einsum('adh,bew,oihw->abdeoi', A, A, weight.astype(jnp.float32))
    wbig = jnp.zeros((2, 2, Cout, 3, 3, Cp), dtype=jnp.float32)
    for a in range(2):
        for b in range(2):
            for dr in range(2):
                for dc in range(2):
                    ro, co = dr - 1 + a, dc - 1 + b
                    wbig = wbig.at[a, b, :, ro + 1, co + 1, :C].set(weff[a, b, dr, dc])
    wbig = wbig.reshape(4 * Cout, 9 * Cp).astype(compute_dtype)

    bbig = jnp.broadcast_to(bias.astype(jnp.float32).reshape(1, Cout), (4, Cout))
    bbig = bbig.reshape(4 * Cout, 1)

    out_isz = jnp.dtype(x.dtype).itemsize
    cost = pl.CostEstimate(
        flops=2 * N * n_blk * (4 * Cout) * (9 * Cp) * S_BLK,
        transcendentals=0,
        bytes_accessed=(N * n_blk * Cp * WIN * cdt.itemsize
                        + 4 * Cout * 9 * Cp * cdt.itemsize
                        + N * 4 * Cout * So_p * out_isz))

    kernel = functools.partial(_upsample_conv_kernel, wp2=Wp2, cp=Cp, s_blk=S_BLK)
    out = pl.pallas_call(
        kernel,
        out_shape=jax.ShapeDtypeStruct((N, 4 * Cout, So_p), x.dtype),
        grid=(N, n_blk),
        in_specs=[
            pl.BlockSpec((1, 1, Cp, WIN), lambda n, s: (n, s, 0, 0)),
            pl.BlockSpec((4 * Cout, 9 * Cp), lambda n, s: (0, 0)),
            pl.BlockSpec((4 * Cout, 1), lambda n, s: (0, 0)),
        ],
        out_specs=pl.BlockSpec((1, 4 * Cout, S_BLK), lambda n, s: (n, 0, s)),
        scratch_shapes=[pltpu.VMEM((9 * Cp, S_BLK), compute_dtype)],
        compiler_params=pltpu.CompilerParams(
            dimension_semantics=("parallel", "parallel")),
        cost_estimate=cost,
    )(xwin, wbig, bbig)

    # De-interleave phases back to NCHW and drop the per-row junk columns.
    # TODO(synk): fuse this pure layout pass into the consumer of Upsample;
    # kept here only because the module contract is an NCHW (N,Cout,2H,2W) tensor.
    y = out[:, :, :So].reshape(N, 2, 2, Cout, H, Wp2)[..., 1:W + 1]
    y = y.transpose(0, 3, 4, 1, 5, 2).reshape(N, Cout, 2 * H, 2 * W)
    return y


def _reference(x, weight, bias):
    """Plain-JAX reference: nearest 2x upsample then conv2d(3x3, pad=1)."""
    u = jnp.repeat(jnp.repeat(x, 2, axis=2), 2, axis=3)
    y = jax.lax.conv_general_dilated(
        u, weight, window_strides=(1, 1), padding=((1, 1), (1, 1)),
        dimension_numbers=("NCHW", "OIHW", "NCHW"))
    return y + bias[None, :, None, None]


if __name__ == "__main__":
    N, C, H, W = 2, 4, 16, 16
    Cout = C  # out_channels defaults to channels

    key = jax.random.PRNGKey(0)
    kx, kw, kb = jax.random.split(key, 3)

    x = jax.random.normal(kx, (N, C, H, W), dtype=jnp.float32)

    # Deterministic init mimicking nn.Conv2d defaults (uniform in +/- 1/sqrt(fan_in)).
    fan_in = C * 3 * 3
    bound = 1.0 / math.sqrt(fan_in)
    weight = jax.random.uniform(kw, (Cout, C, 3, 3), jnp.float32, -bound, bound)
    bias = jax.random.uniform(kb, (Cout,), jnp.float32, -bound, bound)

    ref = jax.block_until_ready(_reference(x, weight, bias))

    # Exact-path check (f32 MXU operands): algorithmic correctness.
    out32 = jax.block_until_ready(
        upsample_forward(x, weight, bias, compute_dtype=jnp.float32))
    assert out32.shape == (N, Cout, 2 * H, 2 * W), out32.shape
    assert jnp.allclose(out32, ref, atol=1e-4, rtol=1e-4), \
        float(jnp.max(jnp.abs(out32 - ref)))

    # Performance default (bf16 MXU operands, f32 accumulation): loose tolerance.
    out16 = jax.block_until_ready(upsample_forward(x, weight, bias))
    assert out16.shape == (N, Cout, 2 * H, 2 * W), out16.shape
    assert jnp.allclose(out16, ref, atol=1e-1, rtol=1e-1), \
        float(jnp.max(jnp.abs(out16 - ref)))

    print("KERNEL_OK")
</pallas_src>

<mosaic_0001>
module attributes {stable_mosaic.version = 11 : i64} {
  func.func @_upsample_conv_kernel(%arg0: i32, %arg1: i32, %arg2: memref<1x1x8x294xf32, #tpu.memory_space<vmem>>, %arg3: memref<16x72xf32, #tpu.memory_space<vmem>>, %arg4: memref<16x1xf32, #tpu.memory_space<vmem>>, %arg5: memref<1x16x256xf32, #tpu.memory_space<vmem>>, %arg6: memref<72x256xf32, #tpu.memory_space<vmem>>) attributes {dimension_semantics = [#tpu.dimension_semantics<parallel>, #tpu.dimension_semantics<parallel>], iteration_bounds = array<i64: 2, 2>, scalar_prefetch = 0 : i64, scratch_operands = 1 : i64, tpu.core_type = #tpu.core_type<tc>, window_params = [{transform_indices = @transform_0, window_bounds = array<i64: 1, 1, 8, 294>}, {pipeline_mode = #tpu.pipeline_mode<synchronous>, transform_indices = @transform_1, window_bounds = array<i64: 16, 72>}, {pipeline_mode = #tpu.pipeline_mode<synchronous>, transform_indices = @transform_2, window_bounds = array<i64: 16, 1>}, {transform_indices = @transform_3, window_bounds = array<i64: 1, 16, 256>}]} {
    %c0 = arith.constant 0 : index
    %c0_0 = arith.constant 0 : index
    %c0_1 = arith.constant 0 : index
    %c0_2 = arith.constant 0 : index
    %0 = vector.load %arg2[%c0, %c0_0, %c0_1, %c0_2] : memref<1x1x8x294xf32, #tpu.memory_space<vmem>>, vector<1x1x8x256xf32>
    %1 = vector.shape_cast %0 : vector<1x1x8x256xf32> to vector<8x256xf32>
    %c0_3 = arith.constant 0 : index
    %c0_4 = arith.constant 0 : index
    %2 = vector.load %arg6[%c0_3, %c0_4] : memref<72x256xf32, #tpu.memory_space<vmem>>, vector<8x256xf32>
    tpu.vector_store %arg6[%c0_3, %c0_4], %1 {strides = array<i32>} : memref<72x256xf32, #tpu.memory_space<vmem>>, vector<8x256xf32>,
    %c0_5 = arith.constant 0 : index
    %c0_6 = arith.constant 0 : index
    %c0_7 = arith.constant 0 : index
    %c1 = arith.constant 1 : index
    %3 = vector.load %arg2[%c0_5, %c0_6, %c0_7, %c1] : memref<1x1x8x294xf32, #tpu.memory_space<vmem>>, vector<1x1x8x256xf32>
    %4 = vector.shape_cast %3 : vector<1x1x8x256xf32> to vector<8x256xf32>
    %c8 = arith.constant 8 : index
    %c0_8 = arith.constant 0 : index
    %5 = vector.load %arg6[%c8, %c0_8] : memref<72x256xf32, #tpu.memory_space<vmem>>, vector<8x256xf32>
    tpu.vector_store %arg6[%c8, %c0_8], %4 {strides = array<i32>} : memref<72x256xf32, #tpu.memory_space<vmem>>, vector<8x256xf32>,
    %c0_9 = arith.constant 0 : index
    %c0_10 = arith.constant 0 : index
    %c0_11 = arith.constant 0 : index
    %c2 = arith.constant 2 : index
    %6 = vector.load %arg2[%c0_9, %c0_10, %c0_11, %c2] : memref<1x1x8x294xf32, #tpu.memory_space<vmem>>, vector<1x1x8x256xf32>
    %7 = vector.shape_cast %6 : vector<1x1x8x256xf32> to vector<8x256xf32>
    %c16 = arith.constant 16 : index
    %c0_12 = arith.constant 0 : index
    %8 = vector.load %arg6[%c16, %c0_12] : memref<72x256xf32, #tpu.memory_space<vmem>>, vector<8x256xf32>
    tpu.vector_store %arg6[%c16, %c0_12], %7 {strides = array<i32>} : memref<72x256xf32, #tpu.memory_space<vmem>>, vector<8x256xf32>,
    %c0_13 = arith.constant 0 : index
    %c0_14 = arith.constant 0 : index
    %c0_15 = arith.constant 0 : index
    %c18 = arith.constant 18 : index
    %9 = vector.load %arg2[%c0_13, %c0_14, %c0_15, %c18] : memref<1x1x8x294xf32, #tpu.memory_space<vmem>>, vector<1x1x8x256xf32>
    %10 = vector.shape_cast %9 : vector<1x1x8x256xf32> to vector<8x256xf32>
    %c24 = arith.constant 24 : index
    %c0_16 = arith.constant 0 : index
    %11 = vector.load %arg6[%c24, %c0_16] : memref<72x256xf32, #tpu.memory_space<vmem>>, vector<8x256xf32>
    tpu.vector_store %arg6[%c24, %c0_16], %10 {strides = array<i32>} : memref<72x256xf32, #tpu.memory_space<vmem>>, vector<8x256xf32>,
    %c0_17 = arith.constant 0 : index
    %c0_18 = arith.constant 0 : index
    %c0_19 = arith.constant 0 : index
    %c19 = arith.constant 19 : index
    %12 = vector.load %arg2[%c0_17, %c0_18, %c0_19, %c19] : memref<1x1x8x294xf32, #tpu.memory_space<vmem>>, vector<1x1x8x256xf32>
    %13 = vector.shape_cast %12 : vector<1x1x8x256xf32> to vector<8x256xf32>
    %c32 = arith.constant 32 : index
    %c0_20 = arith.constant 0 : index
    %14 = vector.load %arg6[%c32, %c0_20] : memref<72x256xf32, #tpu.memory_space<vmem>>, vector<8x256xf32>
    tpu.vector_store %arg6[%c32, %c0_20], %13 {strides = array<i32>} : memref<72x256xf32, #tpu.memory_space<vmem>>, vector<8x256xf32>,
    %c0_21 = arith.constant 0 : index
    %c0_22 = arith.constant 0 : index
    %c0_23 = arith.constant 0 : index
    %c20 = arith.constant 20 : index
    %15 = vector.load %arg2[%c0_21, %c0_22, %c0_23, %c20] : memref<1x1x8x294xf32, #tpu.memory_space<vmem>>, vector<1x1x8x256xf32>
    %16 = vector.shape_cast %15 : vector<1x1x8x256xf32> to vector<8x256xf32>
    %c40 = arith.constant 40 : index
    %c0_24 = arith.constant 0 : index
    %17 = vector.load %arg6[%c40, %c0_24] : memref<72x256xf32, #tpu.memory_space<vmem>>, vector<8x256xf32>
    tpu.vector_store %arg6[%c40, %c0_24], %16 {strides = array<i32>} : memref<72x256xf32, #tpu.memory_space<vmem>>, vector<8x256xf32>,
    %c0_25 = arith.constant 0 : index
    %c0_26 = arith.constant 0 : index
    %c0_27 = arith.constant 0 : index
    %c36 = arith.constant 36 : index
    %18 = vector.load %arg2[%c0_25, %c0_26, %c0_27, %c36] : memref<1x1x8x294xf32, #tpu.memory_space<vmem>>, vector<1x1x8x256xf32>
    %19 = vector.shape_cast %18 : vector<1x1x8x256xf32> to vector<8x256xf32>
    %c48 = arith.constant 48 : index
    %c0_28 = arith.constant 0 : index
    %20 = vector.load %arg6[%c48, %c0_28] : memref<72x256xf32, #tpu.memory_space<vmem>>, vector<8x256xf32>
    tpu.vector_store %arg6[%c48, %c0_28], %19 {strides = array<i32>} : memref<72x256xf32, #tpu.memory_space<vmem>>, vector<8x256xf32>,
    %c0_29 = arith.constant 0 : index
    %c0_30 = arith.constant 0 : index
    %c0_31 = arith.constant 0 : index
    %c37 = arith.constant 37 : index
    %21 = vector.load %arg2[%c0_29, %c0_30, %c0_31, %c37] : memref<1x1x8x294xf32, #tpu.memory_space<vmem>>, vector<1x1x8x256xf32>
    %22 = vector.shape_cast %21 : vector<1x1x8x256xf32> to vector<8x256xf32>
    %c56 = arith.constant 56 : index
    %c0_32 = arith.constant 0 : index
    %23 = vector.load %arg6[%c56, %c0_32] : memref<72x256xf32, #tpu.memory_space<vmem>>, vector<8x256xf32>
    tpu.vector_store %arg6[%c56, %c0_32], %22 {strides = array<i32>} : memref<72x256xf32, #tpu.memory_space<vmem>>, vector<8x256xf32>,
    %c0_33 = arith.constant 0 : index
    %c0_34 = arith.constant 0 : index
    %c0_35 = arith.constant 0 : index
    %c38 = arith.constant 38 : index
    %24 = vector.load %arg2[%c0_33, %c0_34, %c0_35, %c38] : memref<1x1x8x294xf32, #tpu.memory_space<vmem>>, vector<1x1x8x256xf32>
    %25 = vector.shape_cast %24 : vector<1x1x8x256xf32> to vector<8x256xf32>
    %c64 = arith.constant 64 : index
    %c0_36 = arith.constant 0 : index
    %26 = vector.load %arg6[%c64, %c0_36] : memref<72x256xf32, #tpu.memory_space<vmem>>, vector<8x256xf32>
    tpu.vector_store %arg6[%c64, %c0_36], %25 {strides = array<i32>} : memref<72x256xf32, #tpu.memory_space<vmem>>, vector<8x256xf32>,
    %c0_37 = arith.constant 0 : index
    %c0_38 = arith.constant 0 : index
    %27 = vector.load %arg3[%c0_37, %c0_38] : memref<16x72xf32, #tpu.memory_space<vmem>>, vector<16x72xf32>
    %c0_39 = arith.constant 0 : index
    %c0_40 = arith.constant 0 : index
    %28 = vector.load %arg6[%c0_39, %c0_40] : memref<72x256xf32, #tpu.memory_space<vmem>>, vector<72x256xf32>
    %cst = arith.constant dense<0.000000e+00> : vector<16x256xf32>
    %29 = tpu.matmul %27, %28, %cst {dimension_numbers = #tpu.dot_dimension_numbers<[1], [0], [0], [1], [0, 0, 1, 1], [], []>} : vector<16x72xf32>, vector<72x256xf32>, vector<16x256xf32> -> vector<16x256xf32>
    %c0_41 = arith.constant 0 : index
    %c0_42 = arith.constant 0 : index
    %30 = vector.load %arg4[%c0_41, %c0_42] : memref<16x1xf32, #tpu.memory_space<vmem>>, vector<16x1xf32>
    %31 = vector.broadcast %30 : vector<16x1xf32> to vector<16x256xf32>
    %32 = arith.addf %29, %31 : vector<16x256xf32>
    %c0_43 = arith.constant 0 : index
    %c0_44 = arith.constant 0 : index
    %c0_45 = arith.constant 0 : index
    %33 = vector.load %arg5[%c0_43, %c0_44, %c0_45] : memref<1x16x256xf32, #tpu.memory_space<vmem>>, vector<1x16x256xf32>
    %34 = vector.shape_cast %33 : vector<1x16x256xf32> to vector<16x256xf32>
    %35 = vector.shape_cast %32 : vector<16x256xf32> to vector<1x16x256xf32>
    tpu.vector_store %arg5[%c0_43, %c0_44, %c0_45], %35 {strides = array<i32>} : memref<1x16x256xf32, #tpu.memory_space<vmem>>, vector<1x16x256xf32>,
    return
  }
  func.func @transform_0(%arg0: i32, %arg1: i32) -> (i32, i32, i32, i32) {
    %c0_i32 = arith.constant 0 : i32
    %c0_i32_0 = arith.constant 0 : i32
    %c0_i32_1 = arith.constant 0 : i32
    return %arg0, %arg1, %c0_i32, %c0_i32_0 : i32, i32, i32, i32
  }
  func.func @transform_1(%arg0: i32, %arg1: i32) -> (i32, i32) {
    %c0_i32 = arith.constant 0 : i32
    %c0_i32_0 = arith.constant 0 : i32
    %c0_i32_1 = arith.constant 0 : i32
    return %c0_i32, %c0_i32_0 : i32, i32
  }
  func.func @transform_2(%arg0: i32, %arg1: i32) -> (i32, i32) {
    %c0_i32 = arith.constant 0 : i32
    %c0_i32_0 = arith.constant 0 : i32
    %c0_i32_1 = arith.constant 0 : i32
    return %c0_i32, %c0_i32_0 : i32, i32
  }
  func.func @transform_3(%arg0: i32, %arg1: i32) -> (i32, i32, i32) {
    %c0_i32 = arith.constant 0 : i32
    %c0_i32_0 = arith.constant 0 : i32
    return %arg0, %c0_i32, %arg1 : i32, i32, i32
  }
}

</mosaic_0001>

<bundles_post_ra>
// kernel: tpu_custom_call.1
= control target key start
LH: loop header
LB: loop body
LE: loop exit
PB: predicated region body
PF: predicated region fallthrough
CT: control target
= control target key end

     0   :  { %8 = vsyncpa [#allocation4], 0  ;;  %s1135_s0 = inlined_call_operand.hbm [shape: f32[2,2,8,294], index: 0, kind: input, shape index: {}]   ;;  %s1136_s1 = inlined_call_operand.vmem [shape: f32[16,72], index: 1, kind: input, shape index: {}]   ;;  %s1137_s2 = inlined_call_operand.vmem [shape: f32[16,1], index: 2, kind: input, shape index: {}]   ;;  %s1138_s3 = inlined_call_operand.hbm [shape: f32[2,16,512], index: 3, kind: output, shape index: {}]  }
   0x1   :  { %10 = vsyncpa [#allocation4 + $0x1], 0 }
   0x2   :  { %11 = vsyncpa [#allocation5], 0 }
   0x3   :  { %13 = vsyncpa [#allocation5 + $0x1], 0  ;;  %s926_s12 = smov 0   ;;  %s928_s13 = smov 0  }
   0x4   :  { %s930_s14 = smov 0   ;;  %s932_s15 = smov 0  }
   0x5   :  { %s934_s16 = smov 0   ;;  %s936_s17 = smov 0  }
   0x6   :  { %s938_s18 = smov 0   ;;  %s940_s19 = smov 0  }
   0x7 LB: > { %s588_s20 = sadd.s32 4294967295, %s889_s19   ;;  %s589_s21 = sadd.s32 4294967294, %s889_s19   ;;  %s889_s19 = sphi %s940_s19, %s19_s19   ;;  %s885_s18 = sphi %s938_s18, %s1158_s18   ;;  %s881_s17 = sphi %s936_s17, %s1157_s17   ;;  %s877_s16 = sphi %s934_s16, %s1156_s16   ;;  %s873_s15 = sphi %s932_s15, %s1155_s15   ;;  %s869_s14 = sphi %s930_s14, %s1154_s14   ;;  %s865_s13 = sphi %s928_s13, %s1153_s13   ;;  %s861_s12 = sphi %s926_s12, %s1152_s12  }
   0x8   : > { %s28_s22 = sadd.s32 1, %s881_s17  ;;  %s31_s23 = sadd.s32 1, %s885_s18 }
   0x9   : > { %p29_p0 = scmp.ge.s32.totalorder %s28_s22, 2  ;;  %s40_s24 = sadd.s32 1, %s869_s14 }
   0xa   : > { %p47_p1 = scmp.ne.s32.totalorder %s869_s14, %s865_s13  ;;  %p48_p2 = scmp.eq.s32.totalorder %s889_s19, 0 }
   0xb   : > { %s1160_s22 = smov (%p29_p0, %s28_s22), 0  ;;  %s1162_s23 = smov (!%p29_p0, %s31_s23), %s885_s18 }
   0xc   : > { %s36_s25 = ssub.s32 %s881_s17, %s1160_s22  ;;  %p979_p3 = por %p48_p2, %p47_p1 }
   0xd   : > { %p33_p4 = scmp.ge.s32.totalorder %s1162_s23, 2  ;;  %p53_p5 = scmp.ne.s32.totalorder %s865_s13, %s861_s12 }
   0xe   : > { %p54_p6 = scmp.eq.s32.totalorder %s588_s20, 0  ;;  %p121_p7 = scmp.eq.s32.totalorder %s588_s20, 3 }
   0xf   : > { %s1164_s23 = smov (%p33_p4, %s1162_s23), 0  ;;  %p127_p10 = scmp.eq.s32.totalorder %s589_s21, 3 }
  0x10   : > { %1142 = sst [smem:[#allocation9_spill]] %s1164_s23  ;;  %p987_p8 = por %p54_p6, %p53_p5 }
  0x11   : > { %p991_p9 = por %p121_p7, %p47_p1  ;;  %s35_s29 = ssub.s32 %s885_s18, %s1164_s23 }
  0x12   : > { %s37_s30 = sor.u32 %s36_s25, %s35_s29  ;;  %p997_p12 = por %p127_p10, %p53_p5 }
  0x13   : > { %s1144_s28 = scalar_select %p991_p9, 1, 0 }
  0x14   : > { %p38_p11 = scmp.eq.s32.totalorder %s37_s30, 0  ;;  %p645_p13 = scmp.lt.s32.totalorder %s889_s19, 4 }
  0x15   : > { %s1145_s4 = scalar_select %p997_p12, 1, 0 }
  0x16   : > { %s153_s5 = sand.u32 1, %s869_s14   ;;  %s630_s8 = smul.u32 3, %s881_s17 }
  0x17   : > { %s1004_s6 = scalar_select %p38_p11, %s869_s14, %s40_s24  }
  0x18   : > { %s629_s7 = smul.u32 24, %s153_s5  ;;  %p1009_p0 = pnand %p645_p13, %p979_p3 }
  0x19   : > { %s631_s10 = smul.u32 6, %s885_s18  ;;  %s154_s26 = scalar_lea.sflag [#allocation4], %s153_s5 }
  0x1a   : > { %s157_s11 = scalar_lea.vmem [#allocation3], %s629_s7  ;;  %p763_p4 = pneg %p1009_p0 }
  0x1b   : > { %s167_s20 = sshll.u32 %s157_s11, 4  ;;  %s163_s21 = sadd.s32 %s631_s10, %s630_s8  ;;  %s1014_s20 = int_to_ptr.vmem [resolvable:$true] %s167_s20 }
  0x1c   : > { %s592_s25 = sshll.u32 %s163_s21, 7  ;;  %s766_s10 = scalar_lea.hbm %s1135_s0, 1536 }
  0x1d   : > { %s1020_s30 = scalar_lea.hbm %s1135_s0, %s592_s25 }
  0x1e   : > { %s761_s23 = scalar_lea.hbm %s1020_s30, 384  ;;  %p767_p7 = scmp.lt.u32.totalorder %s1020_s30, %s1135_s0 }
  0x1f   : > { %p762_p3 = scmp.ne.s32.totalorder %s1020_s30, %s761_s23  ;;  %p768_p10 = scmp.lt.u32.totalorder %s766_s10, %s761_s23 }
  0x20   : > { %p770_p13 = scmp.lt.u32.totalorder %s761_s23, %s1020_s30 }
  0x21   : > { %p764_p5 = pnand %p763_p4, %p762_p3  ;;  %p769_p11 = por %p768_p10, %p767_p7 }
  0x23   : > { %p765_p6 = pneg %p764_p5  ;;  %p771_p1 = por %p770_p13, %p769_p11 }
  0x25   : > { %p772_p2 = pnand %p771_p1, %p765_p6 }
  0x27   : > { %775 = shalt.err (!%p772_p2)
}
  0x28   : > { %s776_s5 = scalar_lea.vmem %s1014_s20, 384  ;;  %s891_s25 = smov [#allocation3]  }
  0x29   : > { %p777_p3 = scmp.ne.s32.totalorder %s1014_s20, %s776_s5  ;;  %s781_s29 = sshll.u32 %s891_s25, 4  ;;  %s782_s29 = int_to_ptr.vmem [resolvable:$false] %s781_s29 }
  0x2a   : > { %s783_s24 = scalar_lea.vmem %s782_s29, 768  ;;  %p784_p9 = scmp.lt.s32.totalorder %s1014_s20, %s782_s29 }
  0x2b   : > { %p779_p5 = pnand %p777_p3, %p763_p4  ;;  %p785_p7 = scmp.lt.s32.totalorder %s783_s24, %s776_s5 }
  0x2d   : > { %p780_p12 = pneg %p779_p5  ;;  %p786_p10 = por %p785_p7, %p784_p9 }
  0x2f   : > { %p787_p11 = pnand %p786_p10, %p780_p12 }
  0x31   : > { %790 = shalt.err (!%p787_p11)
}
  0x32   : > { %640 = dma.hbm_to_vmem [thread:$0]  (!%p1009_p0), %s1020_s30, 384, %s1014_s20, %s154_s26  }
  0x33   : > { %p1147_p1 = scmp.lt.s32.totalorder %s889_s19, 5  ;;  %p1148_p2 = scmp.ge.s32.totalorder %s889_s19, 1 }
  0x35   : > { %p173_p4 = pnand %p1148_p2, %p1147_p1 }
  0x36   : > { %s1053_s23 = sand.u32 (!%p173_p4), 1, %s865_s13  }
  0x37   : > { %176 = sbr.rel (%p173_p4) target bundleno = 446 (0x1be), region = 32  ;;  %s179_s8 = scalar_lea.sflag (!%p173_p4), [#allocation4], %s1053_s23 }
  0x38   : > { %s632_s7 = smul.u32 (!%p173_p4), 24, %s1053_s23 }
  0x3a   : > { %s182_s10 = scalar_lea.vmem (!%p173_p4), [#allocation3], %s632_s7 }
  0x3e   : > { %852 = dma.done.wait (%p987_p8), %s179_s8, 384  }
  0x3f   : > { %854 = vsyncadd (%p987_p8), %s179_s8, 4294966912  ;;  %v230_v0 = vld [vmem:[%s182_s10 + $0x8] sm:$0xff]  ;;  %v231_v1 = vld [vmem:[%s182_s10 + $0x10] sm:$0xff]  ;;  %s892_s9 = smov 126   ;;  %s893_s20 = smov 127   ;;  %v899_v4 = vmov 0.0  }
  0x40   : > { %v729_v2 = vpack.i.bf16 %v231_v1, %v230_v0  ;;  %v210_v3 = vld [vmem:[%s182_s10] sm:$0xff]  ;;  %s894_s30 = smov 110   ;;  %s895_s26 = smov 108   ;;  %465 = vmatprep.mubr.f32.mxu0 %v899_v4  ;;  %471 = vmatprep.mubr.f32.mxu1 %v899_v4  ;;  %v900_v5 = vmov 0   ;;  %v383_v7 = vld [vmem:[%s1137_s2 + $0x8] sm:$0xff]  ;;  %vm222_vm0 = vcmask 1039360  }
  0x41   : > { %s896_s11 = smov 109   ;;  %s897_s27 = smov 91   ;;  %760 = vset.pattern.permute.xlu0 %v900_v5  ;;  %759 = vset.pattern.permute.xlu1 %v900_v5  ;;  %v382_v6 = vld [vmem:[%s1137_s2] sm:$0xff]  ;;  %vm260_vm1 = vcmask 900096   ;;  %vm241_vm2 = vcmask 1031168   ;;  %vm298_vm3 = vcmask 883712  }
  0x42   : > { %730 = vrot.lane.b32.xlu1 %v729_v2, %s892_s9  ;;  %725 = vrot.lane.b32.xlu0 %v729_v2, %s893_s20  ;;  %s898_s21 = smov 92   ;;  %s901_s5 = smov 90   ;;  %vm279_vm4 = vcmask 891904   ;;  %vm336_vm5 = vcmask 744448   ;;  %vm317_vm6 = vcmask 752640   ;;  %vm355_vm7 = vcmask 736256  }
  0x43   : > { %v362_v62 = vld [vmem:[%s1136_s1] sm:$0xff]  ;;  %vm394_vm8 = vcmask 588800   ;;  %v363_v63 = vld [vmem:[%s1136_s1 + $0x8] sm:$0xff]  ;;  %s483_s24 = scalar_lea.sflag [#allocation5], %s1053_s23  ;;  %p1149_p9 = scmp.ne.s32.totalorder %s1144_s28, 0 }
  0x44   : > { %s902_s8 = smov [#allocation6]  }
  0x45   : > { %s795_s10 = sshll.u32 %s902_s8, 4  ;;  %s796_s10 = int_to_ptr.vmem [resolvable:$false] %s795_s10 }
  0x46   : > { %735 = vrot.lane.b32.xlu1 %v729_v2, %s894_s30  ;;  %216 = vrot.lane.b32.xlu0 %v210_v3, %s893_s20 }
  0x4a   : > { %254 = vrot.lane.b32.xlu1 %v210_v3, %s894_s30  ;;  %235 = vrot.lane.b32.xlu0 %v210_v3, %s892_s9  ;;  %s594_s30 = sshll.u32 %s1053_s23, 5  ;;  %s797_s9 = scalar_lea.vmem %s796_s10, 1024 }
  0x4e   : > { %745 = vrot.lane.b32.xlu1 %v729_v2, %s895_s26  ;;  %740 = vrot.lane.b32.xlu0 %v729_v2, %s896_s11 }
  0x52   : > { %292 = vrot.lane.b32.xlu1 %v210_v3, %s895_s26  ;;  %273 = vrot.lane.b32.xlu0 %v210_v3, %s896_s11  ;;  %s598_s26 = sshll.u32 %s873_s15, 1  ;;  %s599_s11 = sshll.u32 %s877_s16, 3 }
  0x56   : > { %755 = vrot.lane.b32.xlu1 %v729_v2, %s897_s27  ;;  %750 = vrot.lane.b32.xlu0 %v729_v2, %s898_s21 }
  0x5a   : > { %330 = vrot.lane.b32.xlu1 %v210_v3, %s897_s27  ;;  %311 = vrot.lane.b32.xlu0 %v210_v3, %s898_s21  ;;  %s495_s27 = sadd.s32 %s599_s11, %s598_s26  ;;  %s204_s21 = scalar_lea.vmem [#allocation6], %s594_s30 }
  0x5b   : > { %s600_s25 = sshll.u32 %s495_s27, 7 }
  0x5c   : > { %s1081_s29 = scalar_lea.hbm %s1138_s3, %s600_s25 }
  0x5e   : > { %353 = vrot.lane.b32.xlu1 %v231_v1, %s901_s5  ;;  %351 = vrot.lane.b32.xlu0 %v230_v0, %s901_s5 }
  0x62   : > { %349 = vrot.lane.b32.xlu0 %v210_v3, %s901_s5  ;;  %386 = vperm.xlu1 %759, %v382_v6   ;;  %s498_s5 = sshll.u32 %s204_s21, 4  ;;  %s1076_s5 = int_to_ptr.vmem [resolvable:$true] %s498_s5 }
  0x63   : > { %s791_s7 = scalar_lea.vmem %s1076_s5, 512  ;;  %p798_p6 = scmp.lt.s32.totalorder %s1076_s5, %s796_s10 }
  0x64   : > { %p792_p8 = scmp.ne.s32.totalorder %s1076_s5, %s791_s7  ;;  %p799_p13 = scmp.lt.s32.totalorder %s797_s9, %s791_s7 }
  0x66   : > { %391 = vperm.xlu0 %760, %v383_v7   ;;  %p793_p12 = pnand %p792_p8, %p1149_p9  ;;  %p800_p3 = por %p799_p13, %p798_p6 }
  0x68   : > { %p794_p0 = pneg %p793_p12 }
  0x6a   : > { %p801_p5 = pnand %p800_p3, %p794_p0 }
  0xb4   : > { %v731_v8 = vpop.permute.xlu1 %730  ;;  %v726_v9 = vpop.permute.xlu0 %725 }
  0xb5   : > { %v728_v10 = vunpack.i.h.bf16 %v726_v9  ;;  %v727_v11 = vunpack.i.l.bf16 %v726_v9  ;;  %v733_v12 = vunpack.i.h.bf16 %v731_v8  ;;  %v732_v13 = vunpack.i.l.bf16 %v731_v8 }
  0xb7   : > { %v224_v14 = vsel %vm222_vm0, %v727_v11, %v728_v10  ;;  %v243_v22 = vsel %vm241_vm2, %v732_v13, %v733_v12 }
  0xb8   : > { %v736_v15 = vpop.permute.xlu1 %735  ;;  %v217_v16 = vpop.permute.xlu0 %216  ;;  %v603_v17 = vpack.c.bf16 %v224_v14, %v230_v0 }
  0xb9   : > { %v738_v18 = vunpack.i.h.bf16 %v736_v15  ;;  %v737_v19 = vunpack.i.l.bf16 %v736_v15  ;;  %v223_v20 = vsel %vm222_vm0, %v217_v16, %v727_v11 }
  0xba   : > { %604 = vmatprep.subr.bf16.mxu0 %v603_v17  ;;  %619 = vmatprep.subr.bf16.mxu1 %v603_v17  ;;  %v605_v21 = vpack.c.bf16 %v223_v20, %v210_v3 }
  0xbb   : > { %v262_v23 = vsel %vm260_vm1, %v737_v19, %v738_v18 }
  0xbc   : > { %v255_v24 = vpop.permute.xlu1 %254  ;;  %v236_v25 = vpop.permute.xlu0 %235  ;;  %606 = vmatpush1.bf16.msra.mxu0 %v605_v21  ;;  %624 = vmatpush1.bf16.msra.mxu1 %v605_v21  ;;  %v607_v26 = vpack.c.bf16 %v262_v23, %v243_v22 }
  0xbd   : > { %v261_v27 = vsel %vm260_vm1, %v255_v24, %v737_v19  ;;  %v242_v28 = vsel %vm241_vm2, %v236_v25, %v732_v13 }
  0xbe   : > { %v609_v29 = vpack.c.bf16 %v261_v27, %v242_v28  ;;  %608 = vmatprep.subr.bf16.mxu0 %v607_v26  ;;  %620 = vmatprep.subr.bf16.mxu1 %v607_v26 }
  0xc0   : > { %v746_v30 = vpop.permute.xlu1 %745  ;;  %v741_v31 = vpop.permute.xlu0 %740  ;;  %610 = vmatpush1.bf16.msra.mxu0 %v609_v29  ;;  %625 = vmatpush1.bf16.msra.mxu1 %v609_v29 }
  0xc1   : > { %v748_v32 = vunpack.i.h.bf16 %v746_v30  ;;  %v747_v33 = vunpack.i.l.bf16 %v746_v30  ;;  %v743_v34 = vunpack.i.h.bf16 %v741_v31  ;;  %v742_v35 = vunpack.i.l.bf16 %v741_v31 }
  0xc3   : > { %v281_v36 = vsel %vm279_vm4, %v742_v35, %v743_v34  ;;  %v300_v37 = vsel %vm298_vm3, %v747_v33, %v748_v32 }
  0xc4   : > { %v293_v38 = vpop.permute.xlu1 %292  ;;  %v274_v39 = vpop.permute.xlu0 %273  ;;  %v611_v40 = vpack.c.bf16 %v300_v37, %v281_v36 }
  0xc5   : > { %v299_v41 = vsel %vm298_vm3, %v293_v38, %v747_v33  ;;  %v280_v42 = vsel %vm279_vm4, %v274_v39, %v742_v35 }
  0xc6   : > { %v613_v43 = vpack.c.bf16 %v299_v41, %v280_v42  ;;  %612 = vmatprep.subr.bf16.mxu0 %v611_v40  ;;  %621 = vmatprep.subr.bf16.mxu1 %v611_v40 }
  0xc8   : > { %v756_v44 = vpop.permute.xlu1 %755  ;;  %v751_v45 = vpop.permute.xlu0 %750  ;;  %614 = vmatpush1.bf16.msra.mxu0 %v613_v43  ;;  %626 = vmatpush1.bf16.msra.mxu1 %v613_v43 }
  0xc9   : > { %v758_v46 = vunpack.i.h.bf16 %v756_v44  ;;  %v757_v47 = vunpack.i.l.bf16 %v756_v44  ;;  %v753_v48 = vunpack.i.h.bf16 %v751_v45  ;;  %v752_v49 = vunpack.i.l.bf16 %v751_v45 }
  0xcb   : > { %v319_v50 = vsel %vm317_vm6, %v752_v49, %v753_v48  ;;  %v338_v51 = vsel %vm336_vm5, %v757_v47, %v758_v46 }
  0xcc   : > { %v331_v52 = vpop.permute.xlu1 %330  ;;  %v312_v53 = vpop.permute.xlu0 %311  ;;  %v615_v54 = vpack.c.bf16 %v338_v51, %v319_v50 }
  0xcd   : > { %v337_v55 = vsel %vm336_vm5, %v331_v52, %v757_v47  ;;  %v318_v56 = vsel %vm317_vm6, %v312_v53, %v752_v49 }
  0xce   : > { %v617_v57 = vpack.c.bf16 %v337_v55, %v318_v56  ;;  %616 = vmatprep.subr.bf16.mxu0 %v615_v54  ;;  %622 = vmatprep.subr.bf16.mxu1 %v615_v54 }
  0xd0   : > { %v354_v58 = vpop.permute.xlu1 %353  ;;  %v352_v59 = vpop.permute.xlu0 %351  ;;  %618 = vmatpush1.bf16.msra.mxu0 %v617_v57  ;;  %627 = vmatpush1.bf16.msra.mxu1 %v617_v57 }
  0xd1   : > { %v357_v60 = vsel %vm355_vm7, %v352_v59, %v354_v58 }
  0xd2   : > { %417 = vmatprep.subr.mxu0 %v357_v60  ;;  %623 = vmatprep.subr.mxu1 %v357_v60 }
  0xd4   : > { %v350_v61 = vpop.permute.xlu0 %349 }
  0xd5   : > { %v356_v0 = vsel %vm355_vm7, %v350_v61, %v352_v59 }
  0xd6   : > { %418 = vmatpush1.msra.mxu0 %v356_v0  ;;  %628 = vmatpush1.msra.mxu1 %v356_v0 }
  0xd7   : > { %595 = vmatmul.mubr.msk.f32.vlgmr.msra.gmra.mrb[0].mxu0 %vm394_vm8, %v362_v62  ;;  %596 = vmatmul.mubr.msk.f32.vlgmr.msra.gmra.mrb[0].mxu1 %vm394_vm8, %v363_v63 }
  0xe1   : > { %v387_v1 = vpop.permute.xlu1 %386 }
  0xe5   : > { %v392_v2 = vpop.permute.xlu0 %391 }
 0x1aa   : > { %v467_v3 = vpop.f32.mrb[0].mxu0  ;;  %v473_v4 = vpop.f32.mrb[0].mxu1 }
 0x1ab   : > { %v468_v5 = vadd.f32 %v467_v3, %v387_v1  ;;  %v474_v6 = vadd.f32 %v473_v4, %v392_v2  ;;  %v469_v7 = vpop.f32.mrb[1].mxu0  ;;  %v475_v8 = vpop.f32.mrb[1].mxu1 }
 0x1ac   : > { %v470_v9 = vadd.f32 %v469_v7, %v387_v1  ;;  %v476_v10 = vadd.f32 %v475_v8, %v392_v2 }
 0x1ad   : > { %478 = vst [vmem:[%s204_s21] sm:$0xff] %v468_v5  ;;  %480 = vst [vmem:[%s204_s21 + $0x10] sm:$0xff] %v474_v6 }
 0x1ae   : > { %479 = vst [vmem:[%s204_s21 + $0x8] sm:$0xff] %v470_v9  ;;  %481 = vst [vmem:[%s204_s21 + $0x18] sm:$0xff] %v476_v10 }
 0x1af   : > { %804 = shalt.err (!%p801_p5)
}
 0x1b0   : > { %s805_s20 = scalar_lea.hbm %s1081_s29, 512  ;;  %s809_s11 = scalar_lea.hbm %s1138_s3, 2048 }
 0x1b1   : > { %p806_p7 = scmp.ne.s32.totalorder %s1081_s29, %s805_s20  ;;  %p810_p1 = scmp.lt.u32.totalorder %s1081_s29, %s1138_s3 }
 0x1b2   : > { %p811_p2 = scmp.lt.u32.totalorder %s809_s11, %s805_s20  ;;  %p813_p8 = scmp.lt.u32.totalorder %s805_s20, %s1081_s29 }
 0x1b3   : > { %p807_p10 = pnand %p806_p7, %p1149_p9 }
 0x1b4   : > { %p812_p4 = por %p811_p2, %p810_p1 }
 0x1b5   : > { %p808_p11 = pneg %p807_p10 }
 0x1b6   : > { %p814_p12 = por %p813_p8, %p812_p4 }
 0x1b8   : > { %p815_p0 = pnand %p814_p12, %p808_p11 }
 0x1ba   : > { %818 = shalt.err (!%p815_p0)
}
 0x1bb   : > { %s903_s25 = smov 256   ;;  %s904_s15 = smov 512  }
 0x1bc   : > { %s905_s16 = smov 16  }
 0x1bd   : > { %635 = dma.vmem_to_hbm [thread:$0]  (%p1149_p9), %s1076_s5, 512, %s1081_s29, %s483_s24, %s903_s25, %s904_s15, %s905_s16  }
 0x1be PF: > { %p646_p6 = scmp.ge.s32.totalorder %s889_s19, 2  ;;  %s513_s7 = sand.u32 1, %s861_s12  }
 0x1bf   : > { %p1150_p13 = scmp.ne.s32.totalorder %s1145_s4, 0  ;;  %s514_s8 = scalar_lea.sflag [#allocation5], %s513_s7 }
 0x1c1   : > { %p642_p3 = pnand %p646_p6, %p1150_p13 }
 0x1c3   : > { %856 = dma.done.wait (!%p642_p3), %s514_s8, 512  }
 0x1c4   : > { %858 = vsyncadd (!%p642_p3), %s514_s8, 4294966784  ;;  %s19_s19 = sadd.s32 1, %s889_s19   ;;  %s1151_s28 = sld [smem:[#allocation9_spill]] }
 0x1c5   : > { %p16_p5 = scmp.ge.s32.totalorder %s19_s19, 6   ;;  %s1152_s12 = smov %s865_s13 }
 0x1c6   : > { %s1153_s13 = smov %s869_s14  ;;  %s1154_s14 = smov %s1004_s6 }
 0x1c7   : > { %s1155_s15 = smov %s881_s17  ;;  %s1156_s16 = smov %s885_s18 }
 0x1c8   : > { %s1157_s17 = smov %s1160_s22  ;;  %18 = sbr.rel (!%p16_p5) target bundleno = 7 (0x7), region = 77 }
 0x1ca   : > { %s1158_s18 = smov %s1151_s28 }
 0x1cf   :  { %519 = vsyncpa [#allocation4], 1 }
 0x1d0   :  { %521 = vsyncpa [#allocation4 + $0x1], 1 }
 0x1d1   :  { %522 = vsyncpa [#allocation5], 1 }
 0x1d2   :  { %524 = vsyncpa [#allocation5 + $0x1], 1 }

</bundles_post_ra>
